<compile_context>
chip_gen: v6e
topology: v6e:2x2x1
jax: 0.10.0
libtpu: 0.0.40
codegen_flags: <defaults>
</compile_context>

<pallas_src>
import functools

import jax
import jax.numpy as jnp
from jax.experimental import pallas as pl
from jax.experimental.pallas import tpu as pltpu

INPUT_SIZE = 20
GROUP_SIZE = 5
GROUP_OUT = 16
HIDDEN1 = 64      # 4 * 16 after the (folded) concat
HIDDEN2 = 32
OUTPUT_SIZE = 16
DEFAULT_TB = 4096             # amortizes the ~0.35 us/step grid overhead
VMEM_LIMIT_BYTES = 48 * 1024 * 1024   # < v7x 64 MiB physical; plenty elsewhere


def _round_up(n, m):
    return ((n + m - 1) // m) * m


def _cdiv(a, b):
    return -(-a // b)


def _tin_kernel(x_ref, w1_ref, b1_ref, w2_ref, b2_ref, w3_ref, b3_ref, out_ref):
    # HBM stream may be bf16; all math is f32 (v5e VPU has no bf16).
    x = x_ref[...].astype(jnp.float32)

    # four per-slice Linear(5,16)+ReLU folded into one block-diagonal matmul
    h = jnp.dot(x, w1_ref[...], preferred_element_type=jnp.float32) + b1_ref[...]
    h = jnp.maximum(h, 0.0)

    # combiner: Linear(64,32) + ReLU   (dropout == identity in eval)
    h = jnp.dot(h, w2_ref[...], preferred_element_type=jnp.float32) + b2_ref[...]
    h = jnp.maximum(h, 0.0)

    # output: Linear(32,16)            (dropout == identity in eval)
    y = jnp.dot(h, w3_ref[...], preferred_element_type=jnp.float32) + b3_ref[...]
    out_ref[...] = y.astype(out_ref.dtype)


def _fold_processors(params):
    """Fold the four (5,16) processor weights into a block-diagonal (20,64)."""
    w_bd = jax.scipy.linalg.block_diag(
        params["w_price"], params["w_momentum"], params["w_trend"], params["w_volume"]
    )
    b_cat = jnp.concatenate(
        [params["b_price"], params["b_momentum"], params["b_trend"], params["b_volume"]],
        axis=1,
    )
    return w_bd.astype(jnp.float32), b_cat.astype(jnp.float32)


@functools.partial(jax.jit, static_argnames=("tb", "io_dtype"))
def technical_indicator_forward(x, params, *, tb=DEFAULT_TB, io_dtype=jnp.float32):
    """Fused TechnicalIndicatorNetwork forward pass (eval semantics).

    io_dtype: dtype of the HBM x/out streams (jnp.float32 or jnp.bfloat16).
    Compute is always f32.
    """
    batch = x.shape[0]
    x = x.astype(io_dtype)

    w1, b1 = _fold_processors(params)
    w2 = params["w_combiner"].astype(jnp.float32)
    b2 = params["b_combiner"].astype(jnp.float32)
    w3 = params["w_output"].astype(jnp.float32)
    b3 = params["b_output"].astype(jnp.float32)

    # --- batch tiling -------------------------------------------------------
    # TB rows per grid step (multiple of 8 for f32 sublanes).  Cap at
    # ceil(batch/2) so moderate batches give >= 2 grid steps and the
    # "parallel" axis can shard across both v7x TensorCores.
    tb_eff = min(tb, _round_up(batch, 8))
    if batch > 8:
        tb_eff = min(tb_eff, _round_up(_cdiv(batch, 2), 8))
    tb_eff = max(tb_eff, 8)

    padded = _round_up(batch, tb_eff)
    if padded != batch:
        x = jnp.pad(x, ((0, padded - batch), (0, 0)))
    grid = (padded // tb_eff,)

    def resident(shape):
        # weights/biases: same block every grid step -> stay resident in VMEM
        return pl.BlockSpec(shape, lambda i: (0, 0))

    out = pl.pallas_call(
        _tin_kernel,
        out_shape=jax.ShapeDtypeStruct((padded, OUTPUT_SIZE), io_dtype),
        grid=grid,
        in_specs=[
            pl.BlockSpec((tb_eff, INPUT_SIZE), lambda i: (i, 0)),
            resident((INPUT_SIZE, HIDDEN1)),
            resident((1, HIDDEN1)),
            resident((HIDDEN1, HIDDEN2)),
            resident((1, HIDDEN2)),
            resident((HIDDEN2, OUTPUT_SIZE)),
            resident((1, OUTPUT_SIZE)),
        ],
        out_specs=pl.BlockSpec((tb_eff, OUTPUT_SIZE), lambda i: (i, 0)),
        compiler_params=pltpu.CompilerParams(
            dimension_semantics=("parallel",),
            vmem_limit_bytes=VMEM_LIMIT_BYTES,
        ),
    )(x, w1, b1, w2, b2, w3, b3)

    return out[:batch].astype(jnp.float32)


def _linear_init(key, in_features, out_features):
    """PyTorch-style nn.Linear init; weight pre-transposed to (in, out)."""
    wkey, bkey = jax.random.split(key)
    bound = 1.0 / (in_features ** 0.5)
    w = jax.random.uniform(
        wkey, (out_features, in_features), jnp.float32, minval=-bound, maxval=bound
    )
    b = jax.random.uniform(
        bkey, (1, out_features), jnp.float32, minval=-bound, maxval=bound
    )
    return w.T, b


def init_params(key):
    keys = jax.random.split(key, 6)
    w_p, b_p = _linear_init(keys[0], GROUP_SIZE, GROUP_OUT)
    w_m, b_m = _linear_init(keys[1], GROUP_SIZE, GROUP_OUT)
    w_t, b_t = _linear_init(keys[2], GROUP_SIZE, GROUP_OUT)
    w_v, b_v = _linear_init(keys[3], GROUP_SIZE, GROUP_OUT)
    w_c, b_c = _linear_init(keys[4], HIDDEN1, HIDDEN2)
    w_o, b_o = _linear_init(keys[5], HIDDEN2, OUTPUT_SIZE)
    return {
        "w_price": w_p, "b_price": b_p,
        "w_momentum": w_m, "b_momentum": b_m,
        "w_trend": w_t, "b_trend": b_t,
        "w_volume": w_v, "b_volume": b_v,
        "w_combiner": w_c, "b_combiner": b_c,
        "w_output": w_o, "b_output": b_o,
    }


def _reference_forward(x, p):
    """Pure-JAX reference that follows the PyTorch graph op-by-op."""
    hp = jax.lax.Precision.HIGHEST

    def lin(a, w, b):
        return jnp.dot(a, w, precision=hp) + b

    price = jnp.maximum(lin(x[:, 0:5], p["w_price"], p["b_price"]), 0.0)
    momentum = jnp.maximum(lin(x[:, 5:10], p["w_momentum"], p["b_momentum"]), 0.0)
    trend = jnp.maximum(lin(x[:, 10:15], p["w_trend"], p["b_trend"]), 0.0)
    volume = jnp.maximum(lin(x[:, 15:20], p["w_volume"], p["b_volume"]), 0.0)
    combined = jnp.concatenate([price, momentum, trend, volume], axis=1)
    h = jnp.maximum(lin(combined, p["w_combiner"], p["b_combiner"]), 0.0)
    return lin(h, p["w_output"], p["b_output"])


if __name__ == "__main__":
    key = jax.random.PRNGKey(0)
    pkey, xkey = jax.random.split(key)
    params = init_params(pkey)

    # small batch: single grid step
    batch = 8
    x = jax.random.normal(xkey, (batch, INPUT_SIZE), dtype=jnp.float32)
    out = technical_indicator_forward(x, params)
    jax.block_until_ready(out)

    ref = _reference_forward(x, params)
    assert out.shape == (batch, OUTPUT_SIZE)
    assert jnp.allclose(out, ref, atol=1e-4, rtol=1e-4)

    # ragged multi-tile batch: exercises the >=2-step grid + padding path
    batch2 = 300
    x2 = jax.random.normal(jax.random.PRNGKey(1), (batch2, INPUT_SIZE), jnp.float32)
    out2 = technical_indicator_forward(x2, params)
    jax.block_until_ready(out2)

    ref2 = _reference_forward(x2, params)
    assert out2.shape == (batch2, OUTPUT_SIZE)
    assert jnp.allclose(out2, ref2, atol=1e-4, rtol=1e-4)

    # optional bf16 HBM streaming path (f32 compute inside the kernel)
    out3 = technical_indicator_forward(x2, params, io_dtype=jnp.bfloat16)
    jax.block_until_ready(out3)
    assert out3.shape == (batch2, OUTPUT_SIZE)
    assert jnp.allclose(out3, ref2, atol=1e-1, rtol=5e-2)

    print("KERNEL_OK")
</pallas_src>

<mosaic_0001>
module attributes {stable_mosaic.version = 11 : i64} {
  func.func @_tin_kernel(%arg0: i32, %arg1: memref<8x20xf32, #tpu.memory_space<vmem>>, %arg2: memref<20x64xf32, #tpu.memory_space<vmem>>, %arg3: memref<1x64xf32, #tpu.memory_space<vmem>>, %arg4: memref<64x32xf32, #tpu.memory_space<vmem>>, %arg5: memref<1x32xf32, #tpu.memory_space<vmem>>, %arg6: memref<32x16xf32, #tpu.memory_space<vmem>>, %arg7: memref<1x16xf32, #tpu.memory_space<vmem>>, %arg8: memref<8x16xf32, #tpu.memory_space<vmem>>) attributes {dimension_semantics = [#tpu.dimension_semantics<parallel>], iteration_bounds = array<i64: 1>, scalar_prefetch = 0 : i64, scratch_operands = 0 : i64, tpu.core_type = #tpu.core_type<tc>, window_params = [{transform_indices = @transform_0, window_bounds = array<i64: 8, 20>}, {pipeline_mode = #tpu.pipeline_mode<synchronous>, transform_indices = @transform_1, window_bounds = array<i64: 20, 64>}, {pipeline_mode = #tpu.pipeline_mode<synchronous>, transform_indices = @transform_2, window_bounds = array<i64: 1, 64>}, {pipeline_mode = #tpu.pipeline_mode<synchronous>, transform_indices = @transform_3, window_bounds = array<i64: 64, 32>}, {pipeline_mode = #tpu.pipeline_mode<synchronous>, transform_indices = @transform_4, window_bounds = array<i64: 1, 32>}, {pipeline_mode = #tpu.pipeline_mode<synchronous>, transform_indices = @transform_5, window_bounds = array<i64: 32, 16>}, {pipeline_mode = #tpu.pipeline_mode<synchronous>, transform_indices = @transform_6, window_bounds = array<i64: 1, 16>}, {transform_indices = @transform_7, window_bounds = array<i64: 8, 16>}]} {
    %c0 = arith.constant 0 : index
    %c0_0 = arith.constant 0 : index
    %0 = vector.load %arg1[%c0, %c0_0] : memref<8x20xf32, #tpu.memory_space<vmem>>, vector<8x20xf32>
    %c0_1 = arith.constant 0 : index
    %c0_2 = arith.constant 0 : index
    %1 = vector.load %arg2[%c0_1, %c0_2] : memref<20x64xf32, #tpu.memory_space<vmem>>, vector<20x64xf32>
    %cst = arith.constant dense<0.000000e+00> : vector<8x64xf32>
    %2 = tpu.matmul %0, %1, %cst {dimension_numbers = #tpu.dot_dimension_numbers<[1], [0], [0], [1], [0, 0, 1, 1], [], []>} : vector<8x20xf32>, vector<20x64xf32>, vector<8x64xf32> -> vector<8x64xf32>
    %c0_3 = arith.constant 0 : index
    %c0_4 = arith.constant 0 : index
    %3 = vector.load %arg3[%c0_3, %c0_4] : memref<1x64xf32, #tpu.memory_space<vmem>>, vector<1x64xf32>
    %4 = vector.broadcast %3 : vector<1x64xf32> to vector<8x64xf32>
    %5 = arith.addf %2, %4 : vector<8x64xf32>
    %cst_5 = arith.constant 0.000000e+00 : f32
    %6 = vector.broadcast %cst_5 : f32 to vector<8x64xf32>
    %7 = arith.maximumf %5, %6 : vector<8x64xf32>
    %c0_6 = arith.constant 0 : index
    %c0_7 = arith.constant 0 : index
    %8 = vector.load %arg4[%c0_6, %c0_7] : memref<64x32xf32, #tpu.memory_space<vmem>>, vector<64x32xf32>
    %cst_8 = arith.constant dense<0.000000e+00> : vector<8x32xf32>
    %9 = tpu.matmul %7, %8, %cst_8 {dimension_numbers = #tpu.dot_dimension_numbers<[1], [0], [0], [1], [0, 0, 1, 1], [], []>} : vector<8x64xf32>, vector<64x32xf32>, vector<8x32xf32> -> vector<8x32xf32>
    %c0_9 = arith.constant 0 : index
    %c0_10 = arith.constant 0 : index
    %10 = vector.load %arg5[%c0_9, %c0_10] : memref<1x32xf32, #tpu.memory_space<vmem>>, vector<1x32xf32>
    %11 = vector.broadcast %10 : vector<1x32xf32> to vector<8x32xf32>
    %12 = arith.addf %9, %11 : vector<8x32xf32>
    %cst_11 = arith.constant 0.000000e+00 : f32
    %13 = vector.broadcast %cst_11 : f32 to vector<8x32xf32>
    %14 = arith.maximumf %12, %13 : vector<8x32xf32>
    %c0_12 = arith.constant 0 : index
    %c0_13 = arith.constant 0 : index
    %15 = vector.load %arg6[%c0_12, %c0_13] : memref<32x16xf32, #tpu.memory_space<vmem>>, vector<32x16xf32>
    %cst_14 = arith.constant dense<0.000000e+00> : vector<8x16xf32>
    %16 = tpu.matmul %14, %15, %cst_14 {dimension_numbers = #tpu.dot_dimension_numbers<[1], [0], [0], [1], [0, 0, 1, 1], [], []>} : vector<8x32xf32>, vector<32x16xf32>, vector<8x16xf32> -> vector<8x16xf32>
    %c0_15 = arith.constant 0 : index
    %c0_16 = arith.constant 0 : index
    %17 = vector.load %arg7[%c0_15, %c0_16] : memref<1x16xf32, #tpu.memory_space<vmem>>, vector<1x16xf32>
    %18 = vector.broadcast %17 : vector<1x16xf32> to vector<8x16xf32>
    %19 = arith.addf %16, %18 : vector<8x16xf32>
    %c0_17 = arith.constant 0 : index
    %c0_18 = arith.constant 0 : index
    %20 = vector.load %arg8[%c0_17, %c0_18] : memref<8x16xf32, #tpu.memory_space<vmem>>, vector<8x16xf32>
    tpu.vector_store %arg8[%c0_17, %c0_18], %19 {strides = array<i32>} : memref<8x16xf32, #tpu.memory_space<vmem>>, vector<8x16xf32>,
    return
  }
  func.func @transform_0(%arg0: i32) -> (i32, i32) {
    %c0_i32 = arith.constant 0 : i32
    %c0_i32_0 = arith.constant 0 : i32
    return %arg0, %c0_i32 : i32, i32
  }
  func.func @transform_1(%arg0: i32) -> (i32, i32) {
    %c0_i32 = arith.constant 0 : i32
    %c0_i32_0 = arith.constant 0 : i32
    %c0_i32_1 = arith.constant 0 : i32
    return %c0_i32, %c0_i32_0 : i32, i32
  }
  func.func @transform_2(%arg0: i32) -> (i32, i32) {
    %c0_i32 = arith.constant 0 : i32
    %c0_i32_0 = arith.constant 0 : i32
    %c0_i32_1 = arith.constant 0 : i32
    return %c0_i32, %c0_i32_0 : i32, i32
  }
  func.func @transform_3(%arg0: i32) -> (i32, i32) {
    %c0_i32 = arith.constant 0 : i32
    %c0_i32_0 = arith.constant 0 : i32
    %c0_i32_1 = arith.constant 0 : i32
    return %c0_i32, %c0_i32_0 : i32, i32
  }
  func.func @transform_4(%arg0: i32) -> (i32, i32) {
    %c0_i32 = arith.constant 0 : i32
    %c0_i32_0 = arith.constant 0 : i32
    %c0_i32_1 = arith.constant 0 : i32
    return %c0_i32, %c0_i32_0 : i32, i32
  }
  func.func @transform_5(%arg0: i32) -> (i32, i32) {
    %c0_i32 = arith.constant 0 : i32
    %c0_i32_0 = arith.constant 0 : i32
    %c0_i32_1 = arith.constant 0 : i32
    return %c0_i32, %c0_i32_0 : i32, i32
  }
  func.func @transform_6(%arg0: i32) -> (i32, i32) {
    %c0_i32 = arith.constant 0 : i32
    %c0_i32_0 = arith.constant 0 : i32
    %c0_i32_1 = arith.constant 0 : i32
    return %c0_i32, %c0_i32_0 : i32, i32
  }
  func.func @transform_7(%arg0: i32) -> (i32, i32) {
    %c0_i32 = arith.constant 0 : i32
    %c0_i32_0 = arith.constant 0 : i32
    return %arg0, %c0_i32 : i32, i32
  }
}

</mosaic_0001>

<bundles_post_ra>
// kernel: technical_indicator_forward.1
= control target key start
LH: loop header
LB: loop body
LE: loop exit
PB: predicated region body
PF: predicated region fallthrough
CT: control target
= control target key end

     0   :  { %vm42_vm0 = vcmask 1043456   ;;  %v397_v1 = vmov 0.0   ;;  %vm398_vm1 = vmmov 0   ;;  %s503_s0 = inlined_call_operand.vmem [shape: f32[8,20], index: 0, kind: input, shape index: {}]   ;;  %s504_s1 = inlined_call_operand.vmem [shape: f32[20,64], index: 1, kind: input, shape index: {}]   ;;  %s505_s2 = inlined_call_operand.vmem [shape: f32[1,64], index: 2, kind: input, shape index: {}]   ;;  %s506_s3 = inlined_call_operand.vmem [shape: f32[64,32], index: 3, kind: input, shape index: {}]   ;;  %s507_s4 = inlined_call_operand.vmem [shape: f32[1,32], index: 4, kind: input, shape index: {}]   ;;  %s508_s5 = inlined_call_operand.vmem [shape: f32[32,16], index: 5, kind: input, shape index: {}]   ;;  %s509_s6 = inlined_call_operand.vmem [shape: f32[1,16], index: 6, kind: input, shape index: {}]   ;;  %s510_s7 = inlined_call_operand.hbm [shape: f32[8,16], index: 7, kind: output, shape index: {}]  }
   0x1   :  { %v30_v0 = vld [vmem:[%s504_s1 + $0x10] sm:$0xf]  ;;  %333 = vmatprep.subr.mxu0 %v397_v1  ;;  %v29_v2 = vld [vmem:[%s504_s1 + $0x8] sm:$0xff]  ;;  %342 = vmatprep.subr.mxu1 %v397_v1  ;;  %v124_v3 = vld [vmem:[%s506_s3 + $0x38] sm:$0xff] }
   0x2   :  { %334 = vmatpush3.msk.msra.mxu0 %vm42_vm0, %v30_v0  ;;  %339 = vmatprep.mubr.msk.f32.mxu0 %vm398_vm1, %v397_v1  ;;  %v123_v4 = vld [vmem:[%s506_s3 + $0x30] sm:$0xff]  ;;  %v28_v5 = vld [vmem:[%s504_s1] sm:$0xff] }
   0x3   :  { %335 = vmatprep.subr.mxu0 %v397_v1  ;;  %343 = vmatpush3.msra.mxu1 %v124_v3 }
   0x4   :  { %12 = vsyncpa [#allocation3], 0  ;;  %336 = vmatpush3.msra.mxu0 %v29_v2  ;;  %v27_v6 = vld [vmem:[%s503_s0] sm:$0xff]  ;;  %vm38_vm2 = vcmask 162816   ;;  %344 = vmatprep.subr.mxu1 %v397_v1  ;;  %v122_v7 = vld [vmem:[%s506_s3 + $0x28] sm:$0xff]  ;;  %vm132_vm3 = vcmask 523264  }
   0x5   :  { %337 = vmatprep.subr.mxu0 %v397_v1  ;;  %345 = vmatpush3.msra.mxu1 %v123_v4  ;;  %v121_v8 = vld [vmem:[%s506_s3 + $0x20] sm:$0xff]  ;;  %v120_v9 = vld [vmem:[%s506_s3 + $0x18] sm:$0xff]  ;;  %v119_v10 = vld [vmem:[%s506_s3 + $0x10] sm:$0xff]  ;;  %vm218_vm4 = vcmask 261120   ;;  %s399_s12 = smov [#allocation2]   ;;  %vm292_vm5 = vcmask 130048  }
   0x6   :  { %338 = vmatpush3.msra.mxu0 %v28_v5  ;;  %346 = vmatprep.subr.mxu1 %v397_v1  ;;  %v118_v11 = vld [vmem:[%s506_s3 + $0x8] sm:$0xff]  ;;  %v117_v12 = vld [vmem:[%s506_s3] sm:$0xff]  ;;  %v210_v13 = vld [vmem:[%s508_s5 + $0x18] sm:$0xff]  ;;  %s300_s13 = sshll.u32 %s399_s12, 4  ;;  %s301_s13 = int_to_ptr.vmem [resolvable:$true] %s300_s13 }
   0x7   :  { %340 = vmatmul.mubr.msk.f32.vlgmr.msra.gmra.mxu0 %vm38_vm2, %v27_v6  ;;  %347 = vmatpush3.msra.mxu1 %v122_v7  ;;  %v308_v14 = vld [vmem:[%s505_s2] ss:$0 sm:$0xff]  ;;  %v209_v19 = vld [vmem:[%s508_s5 + $0x10] sm:$0xff]  ;;  %v208_v20 = vld [vmem:[%s508_s5 + $0x8] sm:$0xff]  ;;  %p380_p1 = scmp.lt.s32.totalorder %s301_s13, %s301_s13 }
   0x8   :  { %348 = vmatprep.subr.mxu1 %v397_v1  ;;  %358 = vmatprep.mubr.msk.f32.mxu1 %vm398_vm1, %v397_v1  ;;  %v207_v21 = vld [vmem:[%s508_s5] sm:$0xff]  ;;  %s375_s5 = scalar_lea.vmem %s301_s13, 128 }
   0x9   :  { %349 = vmatpush3.msra.mxu1 %v121_v8  ;;  %361 = vmatprep.subr.mxu0 %v397_v1  ;;  %v311_v22 = vld [vmem:[%s507_s4] ss:$0 sm:$0xff]  ;;  %p376_p0 = scmp.ne.s32.totalorder %s301_s13, %s375_s5  ;;  %p381_p2 = scmp.lt.s32.totalorder %s375_s5, %s375_s5 }
   0xa   :  { %350 = vmatprep.subr.mxu1 %v397_v1  ;;  %369 = vmatprep.mubr.msk.f32.mxu0 %vm398_vm1, %v397_v1  ;;  %v313_v27 = vld [vmem:[%s509_s6] ss:$0 sm:$0xff] }
   0xb   :  { %351 = vmatpush3.msra.mxu1 %v120_v9  ;;  %362 = vmatpush3.msra.mxu0 %v210_v13  ;;  %p382_p3 = por %p381_p2, %p380_p1 }
   0xc   :  { %352 = vmatprep.subr.mxu1 %v397_v1  ;;  %363 = vmatprep.subr.mxu0 %v397_v1 }
   0xd   :  { %353 = vmatpush3.msra.mxu1 %v119_v10  ;;  %364 = vmatpush3.msra.mxu0 %v209_v19  ;;  %p383_p4 = pnand %p382_p3, %p376_p0 }
   0xe   :  { %354 = vmatprep.subr.mxu1 %v397_v1  ;;  %365 = vmatprep.subr.mxu0 %v397_v1 }
   0xf   :  { %355 = vmatpush3.msra.mxu1 %v118_v11  ;;  %366 = vmatpush3.msra.mxu0 %v208_v20 }
  0x10   :  { %356 = vmatprep.subr.mxu1 %v397_v1  ;;  %367 = vmatprep.subr.mxu0 %v397_v1 }
  0x11   :  { %357 = vmatpush3.msra.mxu1 %v117_v12  ;;  %368 = vmatpush3.msra.mxu0 %v207_v21 }
  0xc7   :  { %v112_v15 = vpop.f32.mrf.mxu0 }
  0xc8   :  { %v113_v16 = vadd.f32 %v308_v14, %v112_v15 }
  0xc9   :  { %v341_v17 = vpop.f32.mrf.mxu0 }
  0xca   :  { %v116_v18 = vmax.f32 %v113_v16, 0.0 }
  0xcc   :  { %359 = vmatmul.mubr.msk.f32.vlgmr.msra.gmra.mxu1 %vm132_vm3, %v116_v18 }
 0x18c   :  { %v202_v23 = vpop.f32.mrf.mxu1 }
 0x18d   :  { %v203_v24 = vadd.f32 %v311_v22, %v202_v23 }
 0x18e   :  { %v360_v25 = vpop.f32.mrf.mxu1 }
 0x18f   :  { %v206_v26 = vmax.f32 %v203_v24, 0.0 }
 0x191   :  { %370 = vmatmul.mubr.msk.f32.vlgmr.msra.gmra.mxu0 %vm218_vm4, %v206_v26 }
 0x251   :  { %v288_v28 = vpop.f32.mrf.mxu0 }
 0x252   :  { %v289_v29 = vadd.f32 %v313_v27, %v288_v28 }
 0x253   :  { %v371_v30 = vpop.f32.mrf.mxu0 }
 0x254   :  { %293 = vst.msk [vmem:[#allocation2] sm:$0xff] %vm292_vm5, %v289_v29 }
 0x255   :  { %386 = shalt.err (!%p383_p4)
}
 0x256   :  { %303 = dma.vmem_to_hbm [thread:$0]  %s301_s13, 128, %s510_s7, [#allocation3]  }
 0x257   :  { %395 = dma.done.wait [#allocation3], 128  }
 0x258   :  { %396 = vsyncadd [#allocation3], 4294967168 }
 0x259   :  { %307 = vsyncpa [#allocation3], 1 }

</bundles_post_ra>
